<compile_context>
chip_gen: v7x
topology: tpu7x:2x2x1
jax: 0.10.0
libtpu: 0.0.40
codegen_flags: <defaults>
</compile_context>

<pallas_src>
import functools

import jax
import jax.numpy as jnp
from jax.experimental import pallas as pl
from jax.experimental.pallas import tpu as pltpu


def _write_channel_mix(w_f32, x_ref, o_ref, b_f32):
    """o = W @ x (+ b) for each folded batch item.

    w_f32: (C_out, C_in) f32
    x_ref: (NB, C_in, blk) ref
    o_ref: (NB, C_out, blk) ref
    b_f32: (C_out, 1) f32 or None
    """
    nb, c_in, _ = x_ref.shape
    c_out = w_f32.shape[0]
    if c_in <= 8 and c_in * c_out <= 64:
        # Tiny channel mix: unrolled outer-product broadcast-FMAs on the VPU.
        # Gated so VALU work stays well under the HBM roofline even on v5e
        # (no f32 FMA there); anything wider uses the MXU (its own VLIW slot).
        x = x_ref[...].astype(jnp.float32)
        acc = w_f32[None, :, 0:1] * x[:, 0:1, :]
        for ci in range(1, c_in):
            acc = acc + w_f32[None, :, ci:ci + 1] * x[:, ci:ci + 1, :]
        if b_f32 is not None:
            acc = acc + b_f32
        o_ref[...] = acc.astype(o_ref.dtype)
    else:
        # MXU path: one (C_out, C_in) @ (C_in, blk) matmul per folded batch item
        # (NB is a small static constant), f32 accumulation.
        for i in range(nb):
            acc = jnp.dot(w_f32, x_ref[i].astype(jnp.float32),
                          preferred_element_type=jnp.float32)
            if b_f32 is not None:
                acc = acc + b_f32
            o_ref[i] = acc.astype(o_ref.dtype)


def _out_conv_kernel(x_ref, w_ref, o_ref):
    _write_channel_mix(w_ref[...].astype(jnp.float32), x_ref, o_ref, None)


def _out_conv_bias_kernel(x_ref, w_ref, b_ref, o_ref):
    _write_channel_mix(w_ref[...].astype(jnp.float32), x_ref, o_ref,
                       b_ref[...].astype(jnp.float32))


def _round_up(v, m):
    return ((v + m - 1) // m) * m


@functools.partial(jax.jit, static_argnames=("vmem_step_budget",))
def out_conv_forward(x_nchw, weight_oi, bias_o=None,
                     vmem_step_budget=4 * 1024 * 1024):
    """1x1 conv forward.

    x_nchw:    (N, C_in, H, W)
    weight_oi: (C_out, C_in)   -- the (C_out, C_in, 1, 1) conv weight squeezed
    bias_o:    (C_out,) or None
    vmem_step_budget: target HBM bytes (x block + o block) moved per grid step.
    """
    n, c_in, h, w = x_nchw.shape
    c_out = weight_oi.shape[0]
    hw = h * w
    itemsize = x_nchw.dtype.itemsize

    # Channels in sublanes, pixels in lanes. NCHW is already pixel-contiguous,
    # so this reshape is free (no transpose, no extra HBM pass).
    x_flat = x_nchw.reshape(n, c_in, hw)

    # ---- Tile selection: size each grid step from a byte budget -------------
    bytes_per_pix = (c_in + c_out) * itemsize
    target_pix = max(128, vmem_step_budget // bytes_per_pix)

    if hw >= target_pix:
        # Pixel tiles alone fill the per-step budget; lane-aligned tile width.
        blk = max(128, (target_pix // 128) * 128)
        nb = 1
    else:
        # Small images: take the full pixel row and fold batch items per block.
        blk = hw
        nb = max(1, min(n, target_pix // hw))
        if n >= 2:
            # Keep >= 2 grid steps so both v7x TensorCores get work.
            nb = min(nb, max(1, n // 2))
        if n == 1 and hw >= 256:
            # Single image, single tile: split pixels so the grid has 2 steps.
            blk = ((hw // 2 + 127) // 128) * 128

    grid = (pl.cdiv(n, nb), pl.cdiv(hw, blk))

    x_spec = pl.BlockSpec((nb, c_in, blk), lambda b, t: (b, 0, t))
    w_spec = pl.BlockSpec((c_out, c_in), lambda b, t: (0, 0))
    o_spec = pl.BlockSpec((nb, c_out, blk), lambda b, t: (b, 0, t))

    # VMEM budget: double-buffered (x + o) blocks + resident weight/bias, using
    # the sublane/lane-padded sizes that VMEM actually allocates; clamped to
    # v7x's 64 MiB physical ceiling.
    c_in_pad, c_out_pad = _round_up(c_in, 8), _round_up(c_out, 8)
    blk_pad = _round_up(blk, 128)
    step_vmem = nb * blk_pad * (c_in_pad + c_out_pad) * itemsize
    w_vmem = 2 * c_out_pad * _round_up(c_in, 128) * 4
    vmem_limit = int(min(max(2 * step_vmem + w_vmem + (2 << 20), 16 << 20),
                         64 << 20))

    flops = 2 * n * hw * c_in * c_out
    bytes_accessed = (n * hw * (c_in + c_out) + c_in * c_out
                      + (c_out if bias_o is not None else 0)) * itemsize

    common = dict(
        out_shape=jax.ShapeDtypeStruct((n, c_out, hw), x_nchw.dtype),
        compiler_params=pltpu.CompilerParams(
            dimension_semantics=("parallel", "parallel"),
            vmem_limit_bytes=vmem_limit,
        ),
        cost_estimate=pl.CostEstimate(flops=flops, transcendentals=0,
                                      bytes_accessed=bytes_accessed),
    )

    if bias_o is None:
        y = pl.pallas_call(
            _out_conv_kernel,
            grid_spec=pltpu.PrefetchScalarGridSpec(
                num_scalar_prefetch=0,
                grid=grid,
                in_specs=[x_spec, w_spec],
                out_specs=o_spec,
            ),
            **common,
        )(x_flat, weight_oi)
    else:
        b_col = bias_o.reshape(c_out, 1).astype(jnp.float32)
        b_spec = pl.BlockSpec((c_out, 1), lambda b, t: (0, 0))
        y = pl.pallas_call(
            _out_conv_bias_kernel,
            grid_spec=pltpu.PrefetchScalarGridSpec(
                num_scalar_prefetch=0,
                grid=grid,
                in_specs=[x_spec, w_spec, b_spec],
                out_specs=o_spec,
            ),
            **common,
        )(x_flat, weight_oi, b_col)

    return y.reshape(n, c_out, h, w)


if __name__ == "__main__":
    # Module config (matches out_conv(in_channels=4, out_channels=8, bias_bool=False))
    in_channels, out_channels = 4, 8
    N, H, W = 2, 16, 16

    key = jax.random.PRNGKey(0)
    kx, kw, kb, kx2 = jax.random.split(key, 4)
    x = jax.random.normal(kx, (N, in_channels, H, W), dtype=jnp.float32)

    # Deterministic weight init (kaiming-uniform-like bound, as in nn.Conv2d default).
    fan_in = in_channels  # kernel_size = 1
    bound = 1.0 / (fan_in ** 0.5)
    weight = jax.random.uniform(
        kw, (out_channels, in_channels), minval=-bound, maxval=bound,
        dtype=jnp.float32)

    # bias_bool=False path (module default): VPU fast path, batch-folded tiling.
    y = out_conv_forward(x, weight, None)
    jax.block_until_ready(y)
    y_ref = jnp.einsum("nchw,oc->nohw", x, weight,
                       precision=jax.lax.Precision.HIGHEST)
    assert y.shape == (N, out_channels, H, W)
    assert jnp.allclose(y, y_ref, atol=1e-5, rtol=1e-5)

    # bias_bool=True path (specialized bias kernel).
    bias = jax.random.uniform(
        kb, (out_channels,), minval=-bound, maxval=bound, dtype=jnp.float32)
    yb = out_conv_forward(x, weight, bias)
    jax.block_until_ready(yb)
    assert jnp.allclose(yb, y_ref + bias[None, :, None, None],
                        atol=1e-5, rtol=1e-5)

    # Non-divisible pixel-tile path: tiny step budget forces blk=128 over hw=324,
    # exercising partial edge blocks with no pad / slice round trips.
    H2, W2 = 18, 18
    x2 = jax.random.normal(kx2, (N, in_channels, H2, W2), dtype=jnp.float32)
    y2 = out_conv_forward(x2, weight, None, vmem_step_budget=6144)
    jax.block_until_ready(y2)
    y2_ref = jnp.einsum("nchw,oc->nohw", x2, weight,
                        precision=jax.lax.Precision.HIGHEST)
    assert jnp.allclose(y2, y2_ref, atol=1e-5, rtol=1e-5)

    # Wide-output config to exercise the MXU path (c_in*c_out > 64 gate).
    weight_wide = jax.random.uniform(
        kw, (32, in_channels), minval=-bound, maxval=bound, dtype=jnp.float32)
    yw = out_conv_forward(x, weight_wide, None)
    jax.block_until_ready(yw)
    yw_ref = jnp.einsum("nchw,oc->nohw", x, weight_wide,
                        precision=jax.lax.Precision.HIGHEST)
    assert jnp.allclose(yw, yw_ref, atol=1e-4, rtol=1e-4)

    print("KERNEL_OK")
</pallas_src>

<mosaic_0001>
module attributes {stable_mosaic.version = 11 : i64} {
  func.func @_out_conv_kernel(%arg0: i32, %arg1: i32, %arg2: memref<1x4x256xf32, #tpu.memory_space<vmem>>, %arg3: memref<8x4xf32, #tpu.memory_space<vmem>>, %arg4: memref<1x8x256xf32, #tpu.memory_space<vmem>>) attributes {dimension_semantics = [#tpu.dimension_semantics<parallel>, #tpu.dimension_semantics<parallel>], iteration_bounds = array<i64: 2, 1>, scalar_prefetch = 0 : i64, scratch_operands = 0 : i64, tpu.core_type = #tpu.core_type<tc>, window_params = [{transform_indices = @transform_0, window_bounds = array<i64: 1, 4, 256>}, {pipeline_mode = #tpu.pipeline_mode<synchronous>, transform_indices = @transform_1, window_bounds = array<i64: 8, 4>}, {transform_indices = @transform_2, window_bounds = array<i64: 1, 8, 256>}]} {
    %c0 = arith.constant 0 : index
    %c0_0 = arith.constant 0 : index
    %0 = vector.load %arg3[%c0, %c0_0] : memref<8x4xf32, #tpu.memory_space<vmem>>, vector<8x4xf32>
    %c0_1 = arith.constant 0 : index
    %c0_2 = arith.constant 0 : index
    %c0_3 = arith.constant 0 : index
    %1 = vector.load %arg2[%c0_1, %c0_2, %c0_3] : memref<1x4x256xf32, #tpu.memory_space<vmem>>, vector<1x4x256xf32>
    %2 = vector.extract_strided_slice %0 {offsets = [0, 0], sizes = [8, 1], strides = [1, 1]} : vector<8x4xf32> to vector<8x1xf32>
    %3 = vector.shape_cast %2 : vector<8x1xf32> to vector<1x8x1xf32>
    %4 = vector.extract_strided_slice %1 {offsets = [0, 0, 0], sizes = [1, 1, 256], strides = [1, 1, 1]} : vector<1x4x256xf32> to vector<1x1x256xf32>
    %5 = vector.broadcast %3 : vector<1x8x1xf32> to vector<1x8x256xf32>
    %6 = vector.broadcast %4 : vector<1x1x256xf32> to vector<1x8x256xf32>
    %7 = arith.mulf %5, %6 : vector<1x8x256xf32>
    %8 = vector.extract_strided_slice %0 {offsets = [0, 1], sizes = [8, 1], strides = [1, 1]} : vector<8x4xf32> to vector<8x1xf32>
    %9 = vector.shape_cast %8 : vector<8x1xf32> to vector<1x8x1xf32>
    %10 = vector.extract_strided_slice %1 {offsets = [0, 1, 0], sizes = [1, 1, 256], strides = [1, 1, 1]} : vector<1x4x256xf32> to vector<1x1x256xf32>
    %11 = vector.broadcast %9 : vector<1x8x1xf32> to vector<1x8x256xf32>
    %12 = vector.broadcast %10 : vector<1x1x256xf32> to vector<1x8x256xf32>
    %13 = arith.mulf %11, %12 : vector<1x8x256xf32>
    %14 = arith.addf %7, %13 : vector<1x8x256xf32>
    %15 = vector.extract_strided_slice %0 {offsets = [0, 2], sizes = [8, 1], strides = [1, 1]} : vector<8x4xf32> to vector<8x1xf32>
    %16 = vector.shape_cast %15 : vector<8x1xf32> to vector<1x8x1xf32>
    %17 = vector.extract_strided_slice %1 {offsets = [0, 2, 0], sizes = [1, 1, 256], strides = [1, 1, 1]} : vector<1x4x256xf32> to vector<1x1x256xf32>
    %18 = vector.broadcast %16 : vector<1x8x1xf32> to vector<1x8x256xf32>
    %19 = vector.broadcast %17 : vector<1x1x256xf32> to vector<1x8x256xf32>
    %20 = arith.mulf %18, %19 : vector<1x8x256xf32>
    %21 = arith.addf %14, %20 : vector<1x8x256xf32>
    %22 = vector.extract_strided_slice %0 {offsets = [0, 3], sizes = [8, 1], strides = [1, 1]} : vector<8x4xf32> to vector<8x1xf32>
    %23 = vector.shape_cast %22 : vector<8x1xf32> to vector<1x8x1xf32>
    %24 = vector.extract_strided_slice %1 {offsets = [0, 3, 0], sizes = [1, 1, 256], strides = [1, 1, 1]} : vector<1x4x256xf32> to vector<1x1x256xf32>
    %25 = vector.broadcast %23 : vector<1x8x1xf32> to vector<1x8x256xf32>
    %26 = vector.broadcast %24 : vector<1x1x256xf32> to vector<1x8x256xf32>
    %27 = arith.mulf %25, %26 : vector<1x8x256xf32>
    %28 = arith.addf %21, %27 : vector<1x8x256xf32>
    %c0_4 = arith.constant 0 : index
    %c0_5 = arith.constant 0 : index
    %c0_6 = arith.constant 0 : index
    %29 = vector.load %arg4[%c0_4, %c0_5, %c0_6] : memref<1x8x256xf32, #tpu.memory_space<vmem>>, vector<1x8x256xf32>
    tpu.vector_store %arg4[%c0_4, %c0_5, %c0_6], %28 {strides = array<i32>} : memref<1x8x256xf32, #tpu.memory_space<vmem>>, vector<1x8x256xf32>,
    return
  }
  func.func @transform_0(%arg0: i32, %arg1: i32) -> (i32, i32, i32) {
    %c0_i32 = arith.constant 0 : i32
    %c0_i32_0 = arith.constant 0 : i32
    return %arg0, %c0_i32, %arg1 : i32, i32, i32
  }
  func.func @transform_1(%arg0: i32, %arg1: i32) -> (i32, i32) {
    %c0_i32 = arith.constant 0 : i32
    %c0_i32_0 = arith.constant 0 : i32
    %c0_i32_1 = arith.constant 0 : i32
    return %c0_i32, %c0_i32_0 : i32, i32
  }
  func.func @transform_2(%arg0: i32, %arg1: i32) -> (i32, i32, i32) {
    %c0_i32 = arith.constant 0 : i32
    %c0_i32_0 = arith.constant 0 : i32
    return %arg0, %c0_i32, %arg1 : i32, i32, i32
  }
}

</mosaic_0001>

<bundles_post_ra>
// kernel: out_conv_forward.1
= control target key start
LH: loop header
LB: loop body
LE: loop exit
PB: predicated region body
PF: predicated region fallthrough
CT: control target
= control target key end

     0   :  { %s467_s9 = smov 0   ;;  %s469_s10 = smov 0   ;;  %s507_s0 = inlined_call_operand.vmem [shape: f32[2,4,256], index: 0, kind: input, shape index: {}]   ;;  %s508_s1 = inlined_call_operand.vmem [shape: f32[8,4], index: 1, kind: input, shape index: {}]   ;;  %s509_s2 = inlined_call_operand.vmem [shape: f32[2,8,256], index: 2, kind: output, shape index: {}]  }
   0x1   :  { %s471_s11 = smov 0  }
   0x2 LB: > { %s24_s12 = sadd.s32 1, %s442_s10  ;;  %p382_p0 = scmp.ge.s32.totalorder %s446_s11, 1  ;;  %s446_s11 = sphi %s471_s11, %s12_s11   ;;  %s442_s10 = sphi %s469_s10, %s511_s10   ;;  %s438_s9 = sphi %s467_s9, %s510_s9  }
   0x3   : > { %p26_p1 = scmp.ge.s32.totalorder %s24_s12, 2  ;;  %p133_p2 = scmp.lt.s32.totalorder %s446_s11, 3 }
   0x5   : > { %s513_s12 = smov (%p26_p1, %s24_s12), 0  ;;  %p134_p3 = pnand %p382_p0, %p133_p2 }
   0x6   : > { %v183_v0 = vld [vmem:[%s508_s1] sm:$0xff] (!%p134_p3)  ;;  %v448_v1 = vmov (!%p134_p3), 0   ;;  %v449_v2 = vmov (!%p134_p3), 2   ;;  %v450_v3 = vmov (!%p134_p3), 1   ;;  %v451_v4 = vmov (!%p134_p3), 3   ;;  %p164_p4 = scmp.lt.s32.totalorder (!%p134_p3), %s438_s9, 1 }
   0x7   : > { %137 = sbr.rel (%p134_p3) target bundleno = 150 (0x96), region = 28  ;;  %419 = vset.pattern.permute.xlu0 (!%p134_p3), %v448_v1  ;;  %421 = vset.pattern.permute.xlu1 (!%p134_p3), %v449_v2  ;;  %v191_v5 = vlaneseq (!%p134_p3) }
   0x8   : > { %187 = vperm.xlu0 (!%p134_p3), %419, %v183_v0   ;;  %238 = vperm.xlu1 (!%p134_p3), %421, %v183_v0  }
   0x9   : > { %v192_v6 = vshrl.u32 (!%p134_p3), %v191_v5, 7 }
   0xb   : > { %v193_v7 = vsub.s32 (!%p134_p3), 0, %v192_v6  ;;  %v197_v8 = vsub.s32 (!%p134_p3), 4, %v192_v6  ;;  %v217_v9 = vsub.s32 (!%p134_p3), 1, %v192_v6  ;;  %v221_v10 = vsub.s32 (!%p134_p3), 5, %v192_v6 }
   0xc   : > { %420 = vset.pattern.permute.xlu0 (!%p134_p3), %v450_v3  ;;  %422 = vset.pattern.permute.xlu1 (!%p134_p3), %v451_v4  ;;  %v243_v12 = vsub.s32 (!%p134_p3), 2, %v192_v6  ;;  %v247_v13 = vsub.s32 (!%p134_p3), 6, %v192_v6  ;;  %v269_v14 = vsub.s32 (!%p134_p3), 3, %v192_v6  ;;  %v273_v15 = vsub.s32 (!%p134_p3), 7, %v192_v6 }
   0xd   : > { %212 = vperm.xlu0 (!%p134_p3), %420, %v183_v0   ;;  %264 = vperm.xlu1 (!%p134_p3), %422, %v183_v0  }
   0xe   : > { %s515_s9 = smov (!%p164_p4, %s438_s9), 1 }
   0xf   : > { %s389_s15 = sshll.u32 %s515_s9, 3  ;;  %s390_s19 = sshll.u32 %s515_s9, 4 }
  0x10   : > { %s171_s18 = scalar_lea.vmem %s507_s0, %s389_s15  ;;  %s181_s22 = scalar_lea.vmem %s509_s2, %s390_s19 }
  0x11   : > { %423 = vset.pattern.permute.xlu0 %v451_v4  ;;  %v184_v11 = vld [vmem:[%s171_s18] sm:$0xff] }
  0x12   : > { %v194_v16 = vrot.slane %v184_v11, %v193_v7  ;;  %v198_v17 = vrot.slane %v184_v11, %v197_v8  ;;  %v218_v18 = vrot.slane %v184_v11, %v217_v9  ;;  %v222_v19 = vrot.slane %v184_v11, %v221_v10 }
  0x13   : > { %v244_v20 = vrot.slane %v184_v11, %v243_v12  ;;  %v248_v21 = vrot.slane %v184_v11, %v247_v13  ;;  %v270_v24 = vrot.slane %v184_v11, %v269_v14  ;;  %v274_v25 = vrot.slane %v184_v11, %v273_v15 }
  0x14   : > { %v204_v26 = vrot.slane %v194_v16, %v193_v7  ;;  %v208_v27 = vrot.slane %v198_v17, %v193_v7  ;;  %v228_v28 = vrot.slane %v218_v18, %v217_v9  ;;  %v232_v29 = vrot.slane %v222_v19, %v217_v9 }
  0x15   : > { %v254_v30 = vrot.slane %v244_v20, %v243_v12  ;;  %v258_v31 = vrot.slane %v248_v21, %v243_v12  ;;  %v280_v32 = vrot.slane %v270_v24, %v269_v14  ;;  %v284_v33 = vrot.slane %v274_v25, %v269_v14 }
  0x87   : > { %v188_v22 = vpop.permute.xlu0 %187  ;;  %v239_v23 = vpop.permute.xlu1 %238 }
  0x88   : > { %v209_v36 = vmul.f32 %v204_v26, %v188_v22  ;;  %v210_v37 = vmul.f32 %v208_v27, %v188_v22  ;;  %v259_v40 = vmul.f32 %v254_v30, %v239_v23  ;;  %v260_v41 = vmul.f32 %v258_v31, %v239_v23 }
  0x8c   : > { %v213_v34 = vpop.permute.xlu0 %212  ;;  %v265_v35 = vpop.permute.xlu1 %264 }
  0x8d   : > { %v233_v38 = vmul.f32 %v228_v28, %v213_v34  ;;  %v234_v39 = vmul.f32 %v232_v29, %v213_v34  ;;  %v285_v44 = vmul.f32 %v280_v32, %v265_v35  ;;  %v286_v45 = vmul.f32 %v284_v33, %v265_v35 }
  0x8f   : > { %v235_v42 = vadd.f32 %v233_v38, %v209_v36  ;;  %v236_v43 = vadd.f32 %v234_v39, %v210_v37 }
  0x91   : > { %v261_v46 = vadd.f32 %v259_v40, %v235_v42  ;;  %v262_v47 = vadd.f32 %v260_v41, %v236_v43 }
  0x93   : > { %v287_v48 = vadd.f32 %v285_v44, %v261_v46  ;;  %v288_v49 = vadd.f32 %v286_v45, %v262_v47 }
  0x95   : > { %289 = vst [vmem:[%s181_s22] sm:$0xff] %v287_v48  ;;  %290 = vst [vmem:[%s181_s22 + $0x8] sm:$0xff] %v288_v49 }
  0x96 PF: > { %s12_s11 = sadd.s32 1, %s446_s11   ;;  %s510_s9 = smov %s442_s10 }
  0x97   : > { %p9_p5 = scmp.ge.s32.totalorder %s12_s11, 4   ;;  %s511_s10 = smov %s513_s12 }
  0x99   :  { %11 = sbr.rel (!%p9_p5) target bundleno = 2 (0x2), region = 58 }

</bundles_post_ra>
